<compile_context>
chip_gen: v6e
topology: v6e:2x2x1
jax: 0.10.0
libtpu: 0.0.40
codegen_flags: <defaults>
</compile_context>

<pallas_src>
import jax
import jax.numpy as jnp
from jax import lax
from jax.experimental import pallas as pl
from jax.experimental.pallas import tpu as pltpu

LN_EPS = 1e-5


def sdf_kernel(x_ref, w1t_ref, colp_ref, b2_ref, o_ref):
    # Fused Linear -> LayerNorm -> ReLU -> Linear(hidden->1), with the hidden
    # dim on sublanes and rows lane-dense: all intermediates are (hidden, rows).
    x = x_ref[...].astype(jnp.float32)                       # (rows, in_dim)
    w1t = w1t_ref[...].astype(jnp.float32)                   # (hidden, in_dim)

    # (hidden, in) contracted with (rows, in) over the minor dims -> (hidden, rows)
    # (flash-style rhs-transposed matmul; no large-tile transpose, lane-dense out).
    h = lax.dot_general(
        w1t, x,
        dimension_numbers=(((1,), (1,)), ((), ())),
        preferred_element_type=jnp.float32)                  # (hidden, rows)

    cols = colp_ref[...].astype(jnp.float32)                 # (hidden, 4)
    b1 = cols[:, 0:1]                                        # (hidden, 1)
    gamma = cols[:, 1:2]
    beta = cols[:, 2:3]
    w2 = cols[:, 3:4]

    h = h + b1

    # LayerNorm over hidden (axis 0), single pass: E[h], E[h^2] (biased variance,
    # eps inside rsqrt — matches torch.nn.LayerNorm).
    inv_hidden = 1.0 / h.shape[0]
    mean = jnp.sum(h, axis=0, keepdims=True) * inv_hidden            # (1, rows)
    msq = jnp.sum(h * h, axis=0, keepdims=True) * inv_hidden         # (1, rows)
    var = jnp.maximum(msq - mean * mean, 0.0)
    inv_std = lax.rsqrt(var + LN_EPS)
    h = (h - mean) * inv_std * gamma + beta

    # ReLU
    h = jnp.maximum(h, 0.0)

    # Output projection (hidden -> 1): sublane-broadcast multiply + axis-0 reduce.
    out_row = jnp.sum(h * w2, axis=0, keepdims=True) + b2_ref[0]     # (1, rows)

    o_ref[...] = out_row.astype(o_ref.dtype)


def _round_up(v, m):
    return ((v + m - 1) // m) * m


def _pick_tile_rows(n, requested):
    """Choose a row-tile size: big (amortize grid-step overhead), multiple of 128
    (lane-dense output stores), exact-fit for small n, and >=2 tiles for large n
    so dimension_semantics=('parallel',) can shard across v7x's 2 TensorCores."""
    requested = _round_up(max(128, int(requested)), 128)
    if n <= requested:
        if n > 1024:
            # split into (at least) 2 grid steps; last block may be ragged.
            return _round_up((n + 1) // 2, 128)
        return n          # single block == full array: no raggedness at all
    return requested


def signed_distance_field(x, params, *, tile_rows=8192, input_dtype=None,
                          vmem_limit_bytes=None):
    """Returns (sdf, None) mimicking SignedDistanceField.forward (non-recurrent)."""
    orig_shape = x.shape
    orig_dtype = x.dtype
    in_dim = orig_shape[-1]
    x2 = x.reshape(-1, in_dim)
    n = x2.shape[0]
    if n == 0:
        return jnp.zeros(orig_shape[:-1], orig_dtype), None

    if input_dtype is not None:
        # e.g. jnp.bfloat16 on v5e to halve x HBM traffic; kernel upcasts to f32.
        x2 = x2.astype(input_dtype)

    w1 = params["w1"]          # (in_dim, hidden)
    b1 = params["b1"]          # (hidden,)
    gamma = params["gamma"]    # (hidden,)
    beta = params["beta"]      # (hidden,)
    w2 = params["w2"]          # (hidden, 1)
    b2 = params["b2"]          # (1,) -> SMEM scalar
    hidden = w1.shape[1]

    # Pre-shape resident params exactly as consumed in-kernel (one-time, tiny):
    w1t = w1.T                                                 # (hidden, in_dim)
    colp = jnp.stack([b1, gamma, beta, w2[:, 0]], axis=1)      # (hidden, 4)

    t = _pick_tile_rows(n, tile_rows)
    num_tiles = pl.cdiv(n, t)

    out = pl.pallas_call(
        sdf_kernel,
        out_shape=jax.ShapeDtypeStruct((1, n), orig_dtype),
        grid_spec=pltpu.PrefetchScalarGridSpec(
            num_scalar_prefetch=0,
            grid=(num_tiles,),
            in_specs=[
                pl.BlockSpec((t, in_dim), lambda i: (i, 0)),        # x tile
                pl.BlockSpec((hidden, in_dim), lambda i: (0, 0)),   # W1^T (resident)
                pl.BlockSpec((hidden, 4), lambda i: (0, 0)),        # b1/gamma/beta/w2
                pl.BlockSpec(memory_space=pltpu.SMEM),              # b2 scalar
            ],
            out_specs=pl.BlockSpec((1, t), lambda i: (0, i)),       # lane-dense rows
        ),
        compiler_params=pltpu.CompilerParams(
            dimension_semantics=("parallel",),      # row tiles shard across TCs (v7x)
            vmem_limit_bytes=vmem_limit_bytes,
        ),
    )(x2, w1t, colp, b2)

    sdf = out.reshape(orig_shape[:-1])              # .squeeze(-1) equivalent
    return sdf, None


def make_params(key, in_dim, hidden_dim):
    k1, k2, k3, k4 = jax.random.split(key, 4)
    # hidden Linear: kaiming-ish deterministic init (scaled normal)
    w1 = jax.random.normal(k1, (in_dim, hidden_dim), jnp.float32) * (1.0 / jnp.sqrt(in_dim))
    b1 = jax.random.normal(k2, (hidden_dim,), jnp.float32) * 0.01
    # LayerNorm affine params (torch default: gamma=1, beta=0)
    gamma = jnp.ones((hidden_dim,), jnp.float32)
    beta = jnp.zeros((hidden_dim,), jnp.float32)
    # output Linear (hidden -> 1), bias filled with 0.5 per module __init__
    w2 = jax.random.normal(k3, (hidden_dim, 1), jnp.float32) * (1.0 / jnp.sqrt(hidden_dim))
    b2 = jnp.full((1,), 0.5, jnp.float32)
    del k4
    return dict(w1=w1, b1=b1, gamma=gamma, beta=beta, w2=w2, b2=b2)


def reference_forward(x, p):
    h = x @ p["w1"] + p["b1"]
    mean = jnp.mean(h, axis=-1, keepdims=True)
    var = jnp.mean(jnp.square(h - mean), axis=-1, keepdims=True)
    h = (h - mean) * lax.rsqrt(var + LN_EPS) * p["gamma"] + p["beta"]
    h = jnp.maximum(h, 0.0)
    out = h @ p["w2"] + p["b2"]
    return out[..., 0]


if __name__ == "__main__":
    in_dim, hidden_dim = 32, 32          # SignedDistanceField(in_dim=32, hidden_dim=32)
    key = jax.random.PRNGKey(0)
    kx, kx2, kp = jax.random.split(key, 3)
    params = make_params(kp, in_dim, hidden_dim)

    # Small exact-fit case: (2, 64, 32) -> 128 rows, single full-array block.
    x = jax.random.normal(kx, (2, 64, in_dim), jnp.float32)
    sdf, state = signed_distance_field(x, params)
    sdf = jax.block_until_ready(sdf)
    ref = reference_forward(x, params)
    assert sdf.shape == x.shape[:-1]
    assert state is None
    assert jnp.allclose(sdf, ref, atol=1e-4, rtol=1e-4), "mismatch vs reference (exact-fit)"

    # Multi-tile + ragged-last-block + megacore-split path: (3, 700, 32) -> 2100 rows.
    xb = jax.random.normal(kx2, (3, 700, in_dim), jnp.float32)
    sdfb, _ = signed_distance_field(xb, params)
    sdfb = jax.block_until_ready(sdfb)
    refb = reference_forward(xb, params)
    assert sdfb.shape == xb.shape[:-1]
    assert jnp.allclose(sdfb, refb, atol=1e-4, rtol=1e-4), "mismatch vs reference (ragged)"

    print("KERNEL_OK")
</pallas_src>

<mosaic_0001>
module attributes {stable_mosaic.version = 11 : i64} {
  func.func @sdf_kernel(%arg0: i32, %arg1: memref<128x32xf32, #tpu.memory_space<vmem>>, %arg2: memref<32x32xf32, #tpu.memory_space<vmem>>, %arg3: memref<32x4xf32, #tpu.memory_space<vmem>>, %arg4: memref<1xf32, #tpu.memory_space<smem>>, %arg5: memref<1x128xf32, #tpu.memory_space<vmem>>) attributes {dimension_semantics = [#tpu.dimension_semantics<parallel>], iteration_bounds = array<i64: 1>, scalar_prefetch = 0 : i64, scratch_operands = 0 : i64, tpu.core_type = #tpu.core_type<tc>, window_params = [{transform_indices = @transform_0, window_bounds = array<i64: 128, 32>}, {pipeline_mode = #tpu.pipeline_mode<synchronous>, transform_indices = @transform_1, window_bounds = array<i64: 32, 32>}, {pipeline_mode = #tpu.pipeline_mode<synchronous>, transform_indices = @transform_2, window_bounds = array<i64: 32, 4>}, {transform_indices = @transform_3, window_bounds = array<i64: 1>}, {transform_indices = @transform_4, window_bounds = array<i64: 1, 128>}]} {
    %c0 = arith.constant 0 : index
    %c0_0 = arith.constant 0 : index
    %0 = vector.load %arg1[%c0, %c0_0] : memref<128x32xf32, #tpu.memory_space<vmem>>, vector<128x32xf32>
    %c0_1 = arith.constant 0 : index
    %c0_2 = arith.constant 0 : index
    %1 = vector.load %arg2[%c0_1, %c0_2] : memref<32x32xf32, #tpu.memory_space<vmem>>, vector<32x32xf32>
    %cst = arith.constant dense<0.000000e+00> : vector<32x128xf32>
    %2 = tpu.matmul %1, %0, %cst {dimension_numbers = #tpu.dot_dimension_numbers<[1], [1], [0], [0], [0, 0, 1, 0], [], []>} : vector<32x32xf32>, vector<128x32xf32>, vector<32x128xf32> -> vector<32x128xf32>
    %c0_3 = arith.constant 0 : index
    %c0_4 = arith.constant 0 : index
    %3 = vector.load %arg3[%c0_3, %c0_4] : memref<32x4xf32, #tpu.memory_space<vmem>>, vector<32x4xf32>
    %4 = vector.extract_strided_slice %3 {offsets = [0, 0], sizes = [32, 1], strides = [1, 1]} : vector<32x4xf32> to vector<32x1xf32>
    %5 = vector.extract_strided_slice %3 {offsets = [0, 1], sizes = [32, 1], strides = [1, 1]} : vector<32x4xf32> to vector<32x1xf32>
    %6 = vector.extract_strided_slice %3 {offsets = [0, 2], sizes = [32, 1], strides = [1, 1]} : vector<32x4xf32> to vector<32x1xf32>
    %7 = vector.extract_strided_slice %3 {offsets = [0, 3], sizes = [32, 1], strides = [1, 1]} : vector<32x4xf32> to vector<32x1xf32>
    %8 = vector.broadcast %4 : vector<32x1xf32> to vector<32x128xf32>
    %9 = arith.addf %2, %8 : vector<32x128xf32>
    %cst_5 = arith.constant dense<0.000000e+00> : vector<128xf32>
    %10 = vector.multi_reduction <add>, %9, %cst_5 [0] : vector<32x128xf32> to vector<128xf32>
    %11 = vector.shape_cast %10 : vector<128xf32> to vector<1x128xf32>
    %cst_6 = arith.constant 3.125000e-02 : f32
    %12 = vector.broadcast %cst_6 : f32 to vector<1x128xf32>
    %13 = arith.mulf %11, %12 : vector<1x128xf32>
    %14 = arith.mulf %9, %9 : vector<32x128xf32>
    %cst_7 = arith.constant dense<0.000000e+00> : vector<128xf32>
    %15 = vector.multi_reduction <add>, %14, %cst_7 [0] : vector<32x128xf32> to vector<128xf32>
    %16 = vector.shape_cast %15 : vector<128xf32> to vector<1x128xf32>
    %cst_8 = arith.constant 3.125000e-02 : f32
    %17 = vector.broadcast %cst_8 : f32 to vector<1x128xf32>
    %18 = arith.mulf %16, %17 : vector<1x128xf32>
    %19 = arith.mulf %13, %13 : vector<1x128xf32>
    %20 = arith.subf %18, %19 : vector<1x128xf32>
    %cst_9 = arith.constant 0.000000e+00 : f32
    %21 = vector.broadcast %cst_9 : f32 to vector<1x128xf32>
    %22 = arith.maximumf %20, %21 : vector<1x128xf32>
    %cst_10 = arith.constant 9.99999974E-6 : f32
    %23 = vector.broadcast %cst_10 : f32 to vector<1x128xf32>
    %24 = arith.addf %22, %23 : vector<1x128xf32>
    %25 = math.rsqrt %24 : vector<1x128xf32>
    %26 = vector.broadcast %13 : vector<1x128xf32> to vector<32x128xf32>
    %27 = arith.subf %9, %26 : vector<32x128xf32>
    %28 = vector.broadcast %25 : vector<1x128xf32> to vector<32x128xf32>
    %29 = arith.mulf %27, %28 : vector<32x128xf32>
    %30 = vector.broadcast %5 : vector<32x1xf32> to vector<32x128xf32>
    %31 = arith.mulf %29, %30 : vector<32x128xf32>
    %32 = vector.broadcast %6 : vector<32x1xf32> to vector<32x128xf32>
    %33 = arith.addf %31, %32 : vector<32x128xf32>
    %cst_11 = arith.constant 0.000000e+00 : f32
    %34 = vector.broadcast %cst_11 : f32 to vector<32x128xf32>
    %35 = arith.maximumf %33, %34 : vector<32x128xf32>
    %36 = vector.broadcast %7 : vector<32x1xf32> to vector<32x128xf32>
    %37 = arith.mulf %35, %36 : vector<32x128xf32>
    %cst_12 = arith.constant dense<0.000000e+00> : vector<128xf32>
    %38 = vector.multi_reduction <add>, %37, %cst_12 [0] : vector<32x128xf32> to vector<128xf32>
    %39 = vector.shape_cast %38 : vector<128xf32> to vector<1x128xf32>
    %c0_13 = arith.constant 0 : index
    %40 = memref.load %arg4[%c0_13] : memref<1xf32, #tpu.memory_space<smem>>
    %41 = vector.broadcast %40 : f32 to vector<1x128xf32>
    %42 = arith.addf %39, %41 : vector<1x128xf32>
    %c0_14 = arith.constant 0 : index
    %c0_15 = arith.constant 0 : index
    %43 = vector.load %arg5[%c0_14, %c0_15] : memref<1x128xf32, #tpu.memory_space<vmem>>, vector<1x128xf32>
    tpu.vector_store %arg5[%c0_14, %c0_15], %42 {strides = array<i32>} : memref<1x128xf32, #tpu.memory_space<vmem>>, vector<1x128xf32>,
    return
  }
  func.func @transform_0(%arg0: i32) -> (i32, i32) {
    %c0_i32 = arith.constant 0 : i32
    %c0_i32_0 = arith.constant 0 : i32
    return %arg0, %c0_i32 : i32, i32
  }
  func.func @transform_1(%arg0: i32) -> (i32, i32) {
    %c0_i32 = arith.constant 0 : i32
    %c0_i32_0 = arith.constant 0 : i32
    %c0_i32_1 = arith.constant 0 : i32
    return %c0_i32, %c0_i32_0 : i32, i32
  }
  func.func @transform_2(%arg0: i32) -> (i32, i32) {
    %c0_i32 = arith.constant 0 : i32
    %c0_i32_0 = arith.constant 0 : i32
    %c0_i32_1 = arith.constant 0 : i32
    return %c0_i32, %c0_i32_0 : i32, i32
  }
  func.func @transform_3(%arg0: i32) -> i32 {
    %c0_i32 = arith.constant 0 : i32
    %c0_i32_0 = arith.constant 0 : i32
    return %c0_i32 : i32
  }
  func.func @transform_4(%arg0: i32) -> (i32, i32) {
    %c0_i32 = arith.constant 0 : i32
    %c0_i32_0 = arith.constant 0 : i32
    return %c0_i32, %arg0 : i32, i32
  }
}

</mosaic_0001>

<bundles_post_ra>
// kernel: tpu_custom_call.1
= control target key start
LH: loop header
LB: loop body
LE: loop exit
PB: predicated region body
PF: predicated region fallthrough
CT: control target
= control target key end

     0   :  { %vm63_vm0 = vcmask 261120   ;;  %v486_v3 = vmov 0   ;;  %s680_s0 = inlined_call_operand.vmem [shape: f32[128,32], index: 0, kind: input, shape index: {}]   ;;  %s681_s1 = inlined_call_operand.vmem [shape: f32[32,32], index: 1, kind: input, shape index: {}]   ;;  %s682_s2 = inlined_call_operand.vmem [shape: f32[32,4], index: 2, kind: input, shape index: {}]   ;;  %s683_s3 = inlined_call_operand.<no memory space> [shape: f32[1], index: 3, kind: input, shape index: {}]   ;;  %s684_s4 = inlined_call_operand.hbm [shape: f32[1,128], index: 4, kind: output, shape index: {}]  }
   0x1   :  { %v34_v0 = vld [vmem:[%s680_s0 + $0x78] sm:$0xff]  ;;  %v33_v1 = vld [vmem:[%s680_s0 + $0x70] sm:$0xff]  ;;  %v32_v2 = vld [vmem:[%s680_s0 + $0x68] sm:$0xff]  ;;  %452 = vset.pattern.permute.xlu0 %v486_v3  ;;  %453 = vset.pattern.permute.xlu1 %v486_v3 }
   0x2   :  { %377 = vmatprep.subr.msk.mxu0 %vm63_vm0, %v34_v0  ;;  %415 = vmatprep.subr.msk.mxu1 %vm63_vm0, %v34_v0  ;;  %v35_v4 = vld [vmem:[%s681_s1] sm:$0xff]  ;;  %v37_v5 = vld [vmem:[%s681_s1 + $0x10] sm:$0xff] }
   0x3   :  { %378 = vmatpush3.xpose.msk.msra.mxu0 %vm63_vm0, %v34_v0  ;;  %431 = vmatpush3.xpose.msk.msra.mxu1 %vm63_vm0, %v34_v0  ;;  %v542_v6 = vld [vmem:[%s682_s2] sm:$0xff]  ;;  %v549_v7 = vld [vmem:[%s682_s2 + $0x10] sm:$0xff] }
   0x4   :  { %379 = vmatprep.subr.msk.mxu0 %vm63_vm0, %v33_v1  ;;  %416 = vmatprep.subr.msk.mxu1 %vm63_vm0, %v33_v1  ;;  %v31_v8 = vld [vmem:[%s680_s0 + $0x60] sm:$0xff] }
   0x5   :  { %409 = vmatprep.mubr.msk.f32.mxu0 %vm63_vm0, %v35_v4  ;;  %412 = vmatprep.mubr.msk.f32.mxu1 %vm63_vm0, %v37_v5 }
   0x7   :  { %380 = vmatpush3.xpose.msk.msra.mxu0 %vm63_vm0, %v33_v1  ;;  %432 = vmatpush3.xpose.msk.msra.mxu1 %vm63_vm0, %v33_v1 }
   0x8   :  { %381 = vmatprep.subr.msk.mxu0 %vm63_vm0, %v32_v2  ;;  %417 = vmatprep.subr.msk.mxu1 %vm63_vm0, %v32_v2 }
   0x9   :  { %10 = vsyncpa [#allocation4], 0  ;;  %45 = vperm.xlu0 %452, %v542_v6   ;;  %55 = vperm.xlu1 %453, %v549_v7   ;;  %v563_v9 = vld [vmem:[%s682_s2 + $0x8] sm:$0xff]  ;;  %v42_v10 = vld [vmem:[%s682_s2 + $0x18] sm:$0xff]  ;;  %v487_v13 = vmov 1   ;;  %v488_v16 = vmov 2  }
   0xa   :  { %v30_v11 = vld [vmem:[%s680_s0 + $0x58] sm:$0xff]  ;;  %v29_v12 = vld [vmem:[%s680_s0 + $0x50] sm:$0xff]  ;;  %v28_v14 = vld [vmem:[%s680_s0 + $0x48] sm:$0xff]  ;;  %v489_v19 = vmov 3   ;;  %s490_s10 = smov [#allocation3]  }
   0xb   :  { %382 = vmatpush3.xpose.msk.msra.mxu0 %vm63_vm0, %v32_v2  ;;  %433 = vmatpush3.xpose.msk.msra.mxu1 %vm63_vm0, %v32_v2  ;;  %v27_v15 = vld [vmem:[%s680_s0 + $0x40] sm:$0xff]  ;;  %v26_v17 = vld [vmem:[%s680_s0 + $0x38] sm:$0xff]  ;;  %v25_v18 = vld [vmem:[%s680_s0 + $0x30] sm:$0xff]  ;;  %s329_s2 = sshll.u32 %s490_s10, 4  ;;  %s330_s2 = int_to_ptr.vmem [resolvable:$true] %s329_s2 }
   0xc   :  { %383 = vmatprep.subr.msk.mxu0 %vm63_vm0, %v31_v8  ;;  %418 = vmatprep.subr.msk.mxu1 %vm63_vm0, %v31_v8  ;;  %v24_v20 = vld [vmem:[%s680_s0 + $0x28] sm:$0xff]  ;;  %v23_v21 = vld [vmem:[%s680_s0 + $0x20] sm:$0xff]  ;;  %v22_v22 = vld [vmem:[%s680_s0 + $0x18] sm:$0xff]  ;;  %s464_s11 = scalar_lea.vmem %s330_s2, 16  ;;  %s468_s12 = scalar_lea.vmem %s330_s2, 32 }
   0xd   :  { %50 = vperm.xlu0 %452, %v563_v9   ;;  %60 = vperm.xlu1 %453, %v42_v10   ;;  %v21_v23 = vld [vmem:[%s680_s0 + $0x10] sm:$0xff]  ;;  %v20_v24 = vld [vmem:[%s680_s0 + $0x8] sm:$0xff]  ;;  %v19_v25 = vld [vmem:[%s680_s0] sm:$0xff]  ;;  %p465_p0 = scmp.ne.s32.totalorder %s330_s2, %s464_s11  ;;  %p469_p1 = scmp.lt.s32.totalorder %s330_s2, %s330_s2 }
   0xe   :  { %v36_v26 = vld [vmem:[%s681_s1 + $0x8] sm:$0xff]  ;;  %v38_v27 = vld [vmem:[%s681_s1 + $0x18] sm:$0xff]  ;;  %p470_p2 = scmp.lt.s32.totalorder %s468_s12, %s464_s11 }
   0xf   :  { %384 = vmatpush3.xpose.msk.msra.mxu0 %vm63_vm0, %v31_v8  ;;  %434 = vmatpush3.xpose.msk.msra.mxu1 %vm63_vm0, %v31_v8 }
  0x10   :  { %385 = vmatprep.subr.msk.mxu0 %vm63_vm0, %v30_v11  ;;  %419 = vmatprep.subr.msk.mxu1 %vm63_vm0, %v30_v11  ;;  %p471_p3 = por %p470_p2, %p469_p1 }
  0x11   :  { %455 = vset.pattern.permute.xlu1 %v487_v13  ;;  %454 = vset.pattern.permute.xlu0 %v487_v13 }
  0x12   :  { %251 = vperm.xlu1 %455, %v563_v9   ;;  %247 = vperm.xlu0 %454, %v542_v6   ;;  %p472_p4 = pnand %p471_p3, %p465_p0 }
  0x13   :  { %386 = vmatpush3.xpose.msk.msra.mxu0 %vm63_vm0, %v30_v11  ;;  %435 = vmatpush3.xpose.msk.msra.mxu1 %vm63_vm0, %v30_v11 }
  0x14   :  { %387 = vmatprep.subr.msk.mxu0 %vm63_vm0, %v29_v12  ;;  %420 = vmatprep.subr.msk.mxu1 %vm63_vm0, %v29_v12 }
  0x16   :  { %255 = vperm.xlu1 %455, %v549_v7   ;;  %456 = vset.pattern.permute.xlu0 %v488_v16 }
  0x17   :  { %388 = vmatpush3.xpose.msk.msra.mxu0 %vm63_vm0, %v29_v12  ;;  %436 = vmatpush3.xpose.msk.msra.mxu1 %vm63_vm0, %v29_v12 }
  0x18   :  { %389 = vmatprep.subr.msk.mxu0 %vm63_vm0, %v28_v14  ;;  %421 = vmatprep.subr.msk.mxu1 %vm63_vm0, %v28_v14 }
  0x19   :  { %267 = vperm.xlu0 %456, %v542_v6  }
  0x1a   :  { %457 = vset.pattern.permute.xlu1 %v488_v16 }
  0x1b   :  { %390 = vmatpush3.xpose.msk.msra.mxu0 %vm63_vm0, %v28_v14  ;;  %437 = vmatpush3.xpose.msk.msra.mxu1 %vm63_vm0, %v28_v14 }
  0x1c   :  { %391 = vmatprep.subr.msk.mxu0 %vm63_vm0, %v27_v15  ;;  %422 = vmatprep.subr.msk.mxu1 %vm63_vm0, %v27_v15 }
  0x1d   :  { %271 = vperm.xlu1 %457, %v563_v9   ;;  %275 = vperm.xlu0 %456, %v549_v7  }
  0x1f   :  { %392 = vmatpush3.xpose.msk.msra.mxu0 %vm63_vm0, %v27_v15  ;;  %438 = vmatpush3.xpose.msk.msra.mxu1 %vm63_vm0, %v27_v15 }
  0x20   :  { %393 = vmatprep.subr.msk.mxu0 %vm63_vm0, %v26_v17  ;;  %423 = vmatprep.subr.msk.mxu1 %vm63_vm0, %v26_v17 }
  0x21   :  { %458 = vset.pattern.permute.xlu1 %v487_v13  ;;  %460 = vset.pattern.permute.xlu0 %v489_v19 }
  0x22   :  { %259 = vperm.xlu1 %458, %v42_v10   ;;  %291 = vperm.xlu0 %460, %v542_v6  }
  0x23   :  { %394 = vmatpush3.xpose.msk.msra.mxu0 %vm63_vm0, %v26_v17  ;;  %439 = vmatpush3.xpose.msk.msra.mxu1 %vm63_vm0, %v26_v17 }
  0x24   :  { %395 = vmatprep.subr.msk.mxu0 %vm63_vm0, %v25_v18  ;;  %424 = vmatprep.subr.msk.mxu1 %vm63_vm0, %v25_v18 }
  0x26   :  { %459 = vset.pattern.permute.xlu1 %v488_v16  ;;  %303 = vperm.xlu0 %460, %v42_v10  }
  0x27   :  { %396 = vmatpush3.xpose.msk.msra.mxu0 %vm63_vm0, %v25_v18  ;;  %440 = vmatpush3.xpose.msk.msra.mxu1 %vm63_vm0, %v25_v18 }
  0x28   :  { %397 = vmatprep.subr.msk.mxu0 %vm63_vm0, %v24_v20  ;;  %425 = vmatprep.subr.msk.mxu1 %vm63_vm0, %v24_v20 }
  0x29   :  { %279 = vperm.xlu1 %459, %v42_v10  }
  0x2b   :  { %398 = vmatpush3.xpose.msk.msra.mxu0 %vm63_vm0, %v24_v20  ;;  %441 = vmatpush3.xpose.msk.msra.mxu1 %vm63_vm0, %v24_v20 }
  0x2c   :  { %399 = vmatprep.subr.msk.mxu0 %vm63_vm0, %v23_v21  ;;  %426 = vmatprep.subr.msk.mxu1 %vm63_vm0, %v23_v21 }
  0x2d   :  { %461 = vset.pattern.permute.xlu1 %v489_v19 }
  0x2e   :  { %295 = vperm.xlu1 %461, %v563_v9  }
  0x2f   :  { %400 = vmatpush3.xpose.msk.msra.mxu0 %vm63_vm0, %v23_v21  ;;  %442 = vmatpush3.xpose.msk.msra.mxu1 %vm63_vm0, %v23_v21 }
  0x30   :  { %401 = vmatprep.subr.msk.mxu0 %vm63_vm0, %v22_v22  ;;  %427 = vmatprep.subr.msk.mxu1 %vm63_vm0, %v22_v22 }
  0x32   :  { %299 = vperm.xlu1 %461, %v549_v7  }
  0x33   :  { %402 = vmatpush3.xpose.msk.msra.mxu0 %vm63_vm0, %v22_v22  ;;  %443 = vmatpush3.xpose.msk.msra.mxu1 %vm63_vm0, %v22_v22 }
  0x34   :  { %403 = vmatprep.subr.msk.mxu0 %vm63_vm0, %v21_v23  ;;  %428 = vmatprep.subr.msk.mxu1 %vm63_vm0, %v21_v23 }
  0x37   :  { %404 = vmatpush3.xpose.msk.msra.mxu0 %vm63_vm0, %v21_v23  ;;  %444 = vmatpush3.xpose.msk.msra.mxu1 %vm63_vm0, %v21_v23 }
  0x38   :  { %405 = vmatprep.subr.msk.mxu0 %vm63_vm0, %v20_v24  ;;  %429 = vmatprep.subr.msk.mxu1 %vm63_vm0, %v20_v24 }
  0x3b   :  { %406 = vmatpush3.xpose.msk.msra.mxu0 %vm63_vm0, %v20_v24  ;;  %445 = vmatpush3.xpose.msk.msra.mxu1 %vm63_vm0, %v20_v24 }
  0x3c   :  { %407 = vmatprep.subr.msk.mxu0 %vm63_vm0, %v19_v25  ;;  %430 = vmatprep.subr.msk.mxu1 %vm63_vm0, %v19_v25 }
  0x3f   :  { %408 = vmatpush3.xpose.msk.msra.mxu0 %vm63_vm0, %v19_v25  ;;  %446 = vmatpush3.xpose.msk.msra.mxu1 %vm63_vm0, %v19_v25 }
  0x42   :  { %410 = vmatmul.mubr.msk.f32.vlgmr.msra.gmra.mxu0 %vm63_vm0, %v36_v26  ;;  %413 = vmatmul.mubr.msk.f32.vlgmr.msra.gmra.mxu1 %vm63_vm0, %v38_v27 }
  0x84   :  { %v46_v28 = vpop.permute.xlu0 %45  ;;  %v56_v29 = vpop.permute.xlu1 %55 }
  0x88   :  { %v51_v30 = vpop.permute.xlu0 %50  ;;  %v61_v34 = vpop.permute.xlu1 %60 }
  0x8d   :  { %v252_v61 = vpop.permute.xlu1 %251  ;;  %v248_v7 = vpop.permute.xlu0 %247 }
  0x91   :  { %v256_v3 = vpop.permute.xlu1 %255 }
  0x94   :  { %v268_v9 = vpop.permute.xlu0 %267 }
  0x98   :  { %v272_v6 = vpop.permute.xlu1 %271  ;;  %v276_v11 = vpop.permute.xlu0 %275 }
  0x9d   :  { %v260_v8 = vpop.permute.xlu1 %259  ;;  %v292_v26 = vpop.permute.xlu0 %291 }
  0xa4   :  { %v280_v10 = vpop.permute.xlu1 %279 }
  0xa9   :  { %v296_v25 = vpop.permute.xlu1 %295 }
 0x102   :  { %v411_v31 = vpop.f32.mrf.mxu0  ;;  %v414_v32 = vpop.f32.mrf.mxu1 }
 0x103   :  { %v196_v33 = vadd.f32 %v411_v31, %v51_v30  ;;  %v206_v40 = vadd.f32 %v414_v32, %v61_v34 }
 0x104   :  { %v190_v35 = vpop.f32.mrf.mxu0  ;;  %v200_v36 = vpop.f32.mrf.mxu1 }
 0x105   :  { %v191_v37 = vadd.f32 %v190_v35, %v46_v28  ;;  %v201_v38 = vadd.f32 %v200_v36, %v56_v29  ;;  %v220_v39 = vmul.f32 %v196_v33, %v196_v33  ;;  %v222_v46 = vmul.f32 %v206_v40, %v206_v40 }
 0x107   :  { %v209_v41 = vadd.f32 %v196_v33, %v191_v37  ;;  %v219_v42 = vmul.f32 %v191_v37, %v191_v37  ;;  %v221_v45 = vmul.f32 %v201_v38, %v201_v38 }
 0x109   :  { %v223_v43 = vadd.f32 %v220_v39, %v219_v42  ;;  %v210_v44 = vadd.f32 %v209_v41, %v201_v38 }
 0x10b   :  { %v211_v47 = vadd.f32 %v210_v44, %v206_v40  ;;  %v224_v48 = vadd.f32 %v223_v43, %v221_v45 }
 0x10d   :  { %v212_v49 = vrot.slane %v211_v47, 4  ;;  %v225_v50 = vadd.f32 %v224_v48, %v222_v46 }
 0x10f   :  { %v213_v51 = vadd.f32 %v212_v49, %v211_v47  ;;  %v226_v52 = vrot.slane %v225_v50, 4  ;;  %v320_v49 = vstv %s683_s3 }
 0x111   :  { %v214_v53 = vrot.slane %v213_v51, 2  ;;  %v227_v54 = vadd.f32 %v226_v52, %v225_v50 }
 0x113   :  { %v215_v55 = vadd.f32 %v214_v53, %v213_v51  ;;  %v228_v56 = vrot.slane %v227_v54, 2 }
 0x115   :  { %v216_v57 = vrot.slane %v215_v55, 1  ;;  %v229_v58 = vadd.f32 %v228_v56, %v227_v54 }
 0x117   :  { %v217_v59 = vadd.f32 %v216_v57, %v215_v55  ;;  %v230_v60 = vrot.slane %v229_v58, 1 }
 0x119   :  { %v218_v62 = vmul.f32 0.03125, %v217_v59  ;;  %v231_v63 = vadd.f32 %v230_v60, %v229_v58 }
 0x11b   :  { %v232_v0 = vmul.f32 0.03125, %v231_v63  ;;  %v233_v1 = vmul.f32 %v218_v62, %v218_v62  ;;  %v239_v12 = vsub.f32 %v196_v33, %v218_v62  ;;  %v240_v13 = vsub.f32 %v201_v38, %v218_v62  ;;  %v304_v38 = vpop.permute.xlu0 %303 }
 0x11c   :  { %v238_v14 = vsub.f32 %v191_v37, %v218_v62  ;;  %v241_v15 = vsub.f32 %v206_v40, %v218_v62  ;;  %v300_v37 = vpop.permute.xlu1 %299 }
 0x11d   :  { %v234_v2 = vsub.f32 %v232_v0, %v233_v1 }
 0x11f   :  { %v235_v4 = vmax.f32 %v234_v2, 0.0 }
 0x121   :  { %v236_v5 = vadd.f32 1e-05, %v235_v4 }
 0x123   :  { %462 = vrsqrt.f32 %v236_v5 }
 0x130   :  { %v463_v16 = vpop.eup %462 }
 0x131   :  { %v243_v17 = vmul.f32 %v463_v16, %v239_v12  ;;  %v244_v18 = vmul.f32 %v463_v16, %v240_v13  ;;  %v242_v19 = vmul.f32 %v463_v16, %v238_v14  ;;  %v245_v20 = vmul.f32 %v463_v16, %v241_v15 }
 0x133   :  { %v263_v21 = vmul.f32 %v252_v61, %v243_v17  ;;  %v264_v22 = vmul.f32 %v256_v3, %v244_v18  ;;  %v262_v23 = vmul.f32 %v248_v7, %v242_v19  ;;  %v265_v24 = vmul.f32 %v260_v8, %v245_v20 }
 0x135   :  { %v283_v27 = vadd.f32 %v272_v6, %v263_v21  ;;  %v282_v28 = vadd.f32 %v268_v9, %v262_v23  ;;  %v285_v29 = vadd.f32 %v280_v10, %v265_v24  ;;  %v284_v30 = vadd.f32 %v276_v11, %v264_v22 }
 0x137   :  { %v287_v31 = vmax.f32 %v283_v27, 0.0  ;;  %v286_v32 = vmax.f32 %v282_v28, 0.0  ;;  %v288_v33 = vmax.f32 %v284_v30, 0.0  ;;  %v289_v34 = vmax.f32 %v285_v29, 0.0 }
 0x139   :  { %v307_v35 = vmul.f32 %v296_v25, %v287_v31  ;;  %v306_v36 = vmul.f32 %v292_v26, %v286_v32  ;;  %v308_v40 = vmul.f32 %v300_v37, %v288_v33  ;;  %v309_v42 = vmul.f32 %v304_v38, %v289_v34 }
 0x13b   :  { %v310_v39 = vadd.f32 %v307_v35, %v306_v36 }
 0x13d   :  { %v311_v41 = vadd.f32 %v310_v39, %v308_v40 }
 0x13f   :  { %v312_v43 = vadd.f32 %v311_v41, %v309_v42 }
 0x141   :  { %v313_v44 = vrot.slane %v312_v43, 4 }
 0x143   :  { %v314_v45 = vadd.f32 %v313_v44, %v312_v43 }
 0x145   :  { %v315_v46 = vrot.slane %v314_v45, 2 }
 0x147   :  { %v316_v47 = vadd.f32 %v315_v46, %v314_v45 }
 0x149   :  { %v317_v48 = vrot.slane %v316_v47, 1 }
 0x14b   :  { %v318_v50 = vadd.f32 %v317_v48, %v316_v47 }
 0x14d   :  { %v321_v51 = vadd.f32 %v320_v49, %v318_v50 }
 0x14f   :  { %322 = vst [vmem:[#allocation3] sm:$0x1] %v321_v51 }
 0x150   :  { %475 = shalt.err (!%p472_p4)
}
 0x151   :  { %332 = dma.vmem_to_hbm [thread:$0]  %s330_s2, 16, %s684_s4, [#allocation4]  }
 0x152   :  { %484 = dma.done.wait [#allocation4], 16  }
 0x153   :  { %485 = vsyncadd [#allocation4], 4294967280 }
 0x154   :  { %336 = vsyncpa [#allocation4], 1 }

</bundles_post_ra>
